<compile_context>
chip_gen: v7x
topology: tpu7x:2x2x1
jax: 0.10.0
libtpu: 0.0.40
codegen_flags: <defaults>
</compile_context>

<pallas_src>
import math
from functools import partial

import jax
import jax.numpy as jnp
import numpy as np
from jax.experimental import pallas as pl
from jax.experimental.pallas import tpu as pltpu

_LANES = 128  # lane width: full-width vregs and unmasked output stores


def _cosine_cutoff_kernel(d_ref, o_ref, *, a, b, cutoff_lower, cutoff_upper):
    # Load in native dtype, compute in f32 (v5e VPU/EUP have no bf16).
    d = d_ref[...].astype(jnp.float32)
    arg = d * a + b if b != 0.0 else d * a           # affine pre-folded
    cut = 0.5 * (jnp.cos(arg) + 1.0)
    if cutoff_lower > 0.0:
        mask = (d < cutoff_upper) & (d > cutoff_lower)
    else:
        mask = d < cutoff_upper
    o_ref[...] = jnp.where(mask, cut, 0.0).astype(o_ref.dtype)


def cosine_cutoff(dist, *, cutoff_lower=0.0, cutoff_upper=5.0, tile_rows=4096):
    """Cosine cutoff of `dist` (any shape). Returns same shape/dtype as input."""
    orig_shape = dist.shape
    out_dtype = dist.dtype
    flat = dist.reshape(-1)
    N = flat.shape[0]

    if N == 0:  # guard empty inputs (avoids zero-size grid)
        return jnp.zeros(orig_shape, out_dtype)

    cutoff_lower = float(cutoff_lower)
    cutoff_upper = float(cutoff_upper)
    # Fold all scalar math to Python floats at trace time: arg = d*A + B.
    if cutoff_lower > 0.0:
        inv_range = 1.0 / (cutoff_upper - cutoff_lower)
        a = 2.0 * math.pi * inv_range
        b = math.pi * (1.0 - 2.0 * cutoff_lower * inv_range)
    else:
        a = math.pi / cutoff_upper
        b = 0.0

    # Pad only to the 128-lane boundary; zero-copy fast path if already there.
    pad = (-N) % _LANES
    if pad:
        flat = jnp.pad(flat, (0, pad))                # cos(0) is harmless; sliced off below
    rows = (N + pad) // _LANES
    d2 = flat.reshape(rows, _LANES)                   # lane-dense slab

    # Row tile: multiple of 8 sublanes.  Small inputs -> single whole-array
    # block (always a legal block shape).  Large inputs -> fixed tile; a
    # ragged last block is handled by Pallas (masked stores).
    tile_rows = max(8, (int(tile_rows) // 8) * 8)
    tile_rows_eff = rows if rows <= tile_rows else tile_rows
    grid = (pl.cdiv(rows, tile_rows_eff),)

    kernel = partial(_cosine_cutoff_kernel, a=a, b=b,
                     cutoff_lower=cutoff_lower, cutoff_upper=cutoff_upper)

    out2 = pl.pallas_call(
        kernel,
        out_shape=jax.ShapeDtypeStruct((rows, _LANES), out_dtype),
        grid=grid,
        in_specs=[pl.BlockSpec((tile_rows_eff, _LANES), lambda i: (i, 0))],
        out_specs=pl.BlockSpec((tile_rows_eff, _LANES), lambda i: (i, 0)),
        compiler_params=pltpu.CompilerParams(
            dimension_semantics=("parallel",)),   # lets v7x shard across both TCs
    )(d2)

    out_flat = out2.reshape(rows * _LANES)
    if pad:
        out_flat = out_flat[:N]
    return out_flat.reshape(orig_shape)


def _reference(dist, cutoff_lower=0.0, cutoff_upper=5.0):
    d = dist.astype(jnp.float32)
    if cutoff_lower > 0:
        cut = 0.5 * (jnp.cos(math.pi * (2.0 * (d - cutoff_lower)
                                        / (cutoff_upper - cutoff_lower) + 1.0)) + 1.0)
        cut = cut * (d < cutoff_upper).astype(d.dtype)
        cut = cut * (d > cutoff_lower).astype(d.dtype)
        return cut.astype(dist.dtype)
    cut = 0.5 * (jnp.cos(d * math.pi / cutoff_upper) + 1.0)
    return (cut * (d < cutoff_upper).astype(d.dtype)).astype(dist.dtype)


if __name__ == "__main__":
    key = jax.random.PRNGKey(0)

    # Case 1: the module's own example input: linspace(0, 5, 100), lower == 0.
    dist_lin = jnp.linspace(0.0, 5.0, 100, dtype=jnp.float32)
    out = jax.block_until_ready(cosine_cutoff(dist_lin, cutoff_lower=0.0, cutoff_upper=5.0))
    np.testing.assert_allclose(np.asarray(out),
                               np.asarray(_reference(dist_lin, 0.0, 5.0)),
                               rtol=1e-5, atol=1e-6)

    # Case 2: N % 128 == 0 zero-copy fast path, both branches (lower == 0 and > 0).
    dist256 = jax.random.uniform(key, (256,), dtype=jnp.float32) * 6.0
    out0 = jax.block_until_ready(cosine_cutoff(dist256, cutoff_lower=0.0, cutoff_upper=5.0))
    np.testing.assert_allclose(np.asarray(out0),
                               np.asarray(_reference(dist256, 0.0, 5.0)),
                               rtol=1e-5, atol=1e-6)
    out1 = jax.block_until_ready(cosine_cutoff(dist256, cutoff_lower=1.0, cutoff_upper=5.0))
    np.testing.assert_allclose(np.asarray(out1),
                               np.asarray(_reference(dist256, 1.0, 5.0)),
                               rtol=1e-5, atol=1e-6)

    # Case 3: ragged N (pad path) + multi-step grid with a partial last
    # row-block (tiny tile_rows to exercise Pallas edge-block masking).
    dist_ragged = jax.random.uniform(jax.random.fold_in(key, 1), (1701,),
                                     dtype=jnp.float32) * 6.0
    out2 = jax.block_until_ready(
        cosine_cutoff(dist_ragged, cutoff_lower=1.0, cutoff_upper=5.0, tile_rows=8))
    np.testing.assert_allclose(np.asarray(out2),
                               np.asarray(_reference(dist_ragged, 1.0, 5.0)),
                               rtol=1e-5, atol=1e-6)

    print("KERNEL_OK")
</pallas_src>

<mosaic_0001>
module attributes {stable_mosaic.version = 11 : i64} {
  func.func @_cosine_cutoff_kernel(%arg0: i32, %arg1: memref<1x128xf32, #tpu.memory_space<vmem>>, %arg2: memref<1x128xf32, #tpu.memory_space<vmem>>) attributes {dimension_semantics = [#tpu.dimension_semantics<parallel>], iteration_bounds = array<i64: 1>, scalar_prefetch = 0 : i64, scratch_operands = 0 : i64, tpu.core_type = #tpu.core_type<tc>, window_params = [{transform_indices = @transform_0, window_bounds = array<i64: 1, 128>}, {transform_indices = @transform_1, window_bounds = array<i64: 1, 128>}]} {
    %c0 = arith.constant 0 : index
    %c0_0 = arith.constant 0 : index
    %0 = vector.load %arg1[%c0, %c0_0] : memref<1x128xf32, #tpu.memory_space<vmem>>, vector<1x128xf32>
    %cst = arith.constant 0.628318548 : f32
    %1 = vector.broadcast %cst : f32 to vector<1x128xf32>
    %2 = arith.mulf %0, %1 : vector<1x128xf32>
    %3 = math.cos %2 : vector<1x128xf32>
    %cst_1 = arith.constant 1.000000e+00 : f32
    %4 = vector.broadcast %cst_1 : f32 to vector<1x128xf32>
    %5 = arith.addf %3, %4 : vector<1x128xf32>
    %cst_2 = arith.constant 5.000000e-01 : f32
    %6 = vector.broadcast %cst_2 : f32 to vector<1x128xf32>
    %7 = arith.mulf %6, %5 : vector<1x128xf32>
    %cst_3 = arith.constant 5.000000e+00 : f32
    %8 = vector.broadcast %cst_3 : f32 to vector<1x128xf32>
    %9 = arith.cmpf olt, %0, %8 : vector<1x128xf32>
    %cst_4 = arith.constant 0.000000e+00 : f32
    %10 = vector.broadcast %cst_4 : f32 to vector<1x128xf32>
    %11 = arith.select %9, %7, %10 : vector<1x128xi1>, vector<1x128xf32>
    %c0_5 = arith.constant 0 : index
    %c0_6 = arith.constant 0 : index
    %12 = vector.load %arg2[%c0_5, %c0_6] : memref<1x128xf32, #tpu.memory_space<vmem>>, vector<1x128xf32>
    tpu.vector_store %arg2[%c0_5, %c0_6], %11 {strides = array<i32>} : memref<1x128xf32, #tpu.memory_space<vmem>>, vector<1x128xf32>,
    return
  }
  func.func @transform_0(%arg0: i32) -> (i32, i32) {
    %c0_i32 = arith.constant 0 : i32
    %c0_i32_0 = arith.constant 0 : i32
    return %arg0, %c0_i32 : i32, i32
  }
  func.func @transform_1(%arg0: i32) -> (i32, i32) {
    %c0_i32 = arith.constant 0 : i32
    %c0_i32_0 = arith.constant 0 : i32
    return %arg0, %c0_i32 : i32, i32
  }
}

</mosaic_0001>

<bundles_post_ra>
// kernel: tpu_custom_call.1
= control target key start
LH: loop header
LB: loop body
LE: loop exit
PB: predicated region body
PF: predicated region fallthrough
CT: control target
= control target key end

     0   :  { %6 = vsyncpa [#allocation3], 0  ;;  %s281_s0 = inlined_call_operand.hbm [shape: f32[1,128], index: 0, kind: input, shape index: {}]   ;;  %s282_s1 = inlined_call_operand.hbm [shape: f32[1,128], index: 1, kind: output, shape index: {}]  }
   0x1   :  { %7 = vsyncpa [#allocation4], 0  ;;  %s214_s6 = smov [#allocation2]   ;;  %s166_s10 = scalar_lea.hbm %s281_s0, 16 }
   0x2   :  { %s14_s7 = sshll.u32 %s214_s6, 4  ;;  %p167_p0 = scmp.ne.s32.totalorder %s281_s0, %s166_s10  ;;  %s15_s7 = int_to_ptr.vmem [resolvable:$true] %s14_s7 }
   0x3   :  { %p170_p1 = scmp.lt.u32.totalorder %s166_s10, %s281_s0 }
   0x5   :  { %p172_p2 = pnand %p170_p1, %p167_p0 }
   0x7   :  { %175 = shalt.err (!%p172_p2)
}
   0x8   :  { %s176_s15 = scalar_lea.vmem %s15_s7, 16  ;;  %s180_s16 = scalar_lea.vmem %s15_s7, 32 }
   0x9   :  { %p177_p3 = scmp.ne.s32.totalorder %s15_s7, %s176_s15  ;;  %p181_p4 = scmp.lt.s32.totalorder %s15_s7, %s15_s7 }
   0xa   :  { %p182_p5 = scmp.lt.s32.totalorder %s180_s16, %s176_s15 }
   0xc   :  { %p183_p6 = por %p182_p5, %p181_p4 }
   0xe   :  { %p184_p7 = pnand %p183_p6, %p177_p3 }
  0x10   :  { %187 = shalt.err (!%p184_p7)
}
  0x11   :  { %17 = dma.hbm_to_vmem [thread:$0]  %s281_s0, 16, %s15_s7, [#allocation3]  }
  0x12   :  { %210 = dma.done.wait [#allocation3], 16  }
  0x13   :  { %211 = vsyncadd [#allocation3], 4294967280  ;;  %v244_v0 = vld [vmem:[#allocation2] sm:$0x1]  ;;  %v215_v13 = vmov 683565275  }
  0x14   :  { %v247_v1 = vmul.f32 0.62831855, %v244_v0  ;;  %v216_v15 = vmov 2475754826   ;;  %v217_v17 = vmov 2131351028  }
  0x15   :  { %v218_v19 = vmov 2102212464   ;;  %v219_v21 = vmov 920167782   ;;  %v220_v28 = vmov 1326507024  }
  0x16   :  { %v26_v2 = vand.u32 2139095040, %v247_v1  ;;  %v23_v4 = vand.u32 2147483647, %v247_v1  ;;  %vm25_vm7 = vcmp.lt.s32.totalorder %v247_v1, 0  ;;  %vm115_vm12 = vweird.f32 %v247_v1  ;;  %s221_s0 = smov [#allocation5]  }
  0x17   :  { %s137_s19 = sshll.u32 %s221_s0, 4  ;;  %vm128_vm13 = vcmp.lt.f32.partialorder %v244_v0, 5.0  ;;  %s138_s19 = int_to_ptr.vmem [resolvable:$true] %s137_s19 }
  0x18   :  { %v27_v3 = vshrl.u32 %v26_v2, 23  ;;  %v30_v7 = vand.u32 8388607, %v23_v4  ;;  %vm24_vm8 = vcmp.le.f32.partialorder %v23_v4, 0.7853982  ;;  %s188_s20 = scalar_lea.vmem %s138_s19, 16  ;;  %p193_p9 = scmp.lt.s32.totalorder %s138_s19, %s138_s19 }
  0x19   :  { %p189_p8 = scmp.ne.s32.totalorder %s138_s19, %s188_s20  ;;  %s192_s21 = scalar_lea.vmem %s138_s19, 32 }
  0x1a   :  { %v146_v5 = vadd.s32 4294967169, %v27_v3  ;;  %v31_v10 = vor.u32 8388608, %v30_v7  ;;  %p194_p10 = scmp.lt.s32.totalorder %s192_s21, %s188_s20 }
  0x1c   :  { %v33_v6 = vadd.s32 1, %v146_v5  ;;  %v71_v30 = vshll.u32 %v31_v10, 8  ;;  %p195_p11 = por %p194_p10, %p193_p9 }
  0x1e   :  { %vm34_vm0 = vcmp.gt.s32.totalorder %v33_v6, 0  ;;  %p196_p12 = pnand %p195_p11, %p189_p8 }
  0x1f   :  { %v35_v8 = vsel %vm34_vm0, %v33_v6, 0 }
  0x20   :  { %v37_v9 = vand.u32 31, %v35_v8  ;;  %v36_v11 = vshrl.u32 %v35_v8, 5 }
  0x22   :  { %v38_v12 = vsub.s32 32, %v37_v9  ;;  %v40_v14 = vshll.u32 %v215_v13, %v37_v9  ;;  %v43_v16 = vshll.u32 %v216_v15, %v37_v9  ;;  %v46_v18 = vshll.u32 %v217_v17, %v37_v9 }
  0x23   :  { %v49_v20 = vshll.u32 %v218_v19, %v37_v9  ;;  %v52_v22 = vshll.u32 %v219_v21, %v37_v9  ;;  %vm55_vm1 = vcmp.lt.s32.totalorder %v36_v11, 1  ;;  %vm58_vm2 = vcmp.lt.s32.totalorder %v36_v11, 4 }
  0x24   :  { %v39_v23 = vshrl.u32 %v215_v13, %v38_v12  ;;  %v41_v24 = vshrl.u32 %v216_v15, %v38_v12  ;;  %v44_v25 = vshrl.u32 %v217_v17, %v38_v12  ;;  %v47_v26 = vshrl.u32 %v218_v19, %v38_v12 }
  0x25   :  { %v50_v27 = vshrl.u32 %v219_v21, %v38_v12  ;;  %v53_v29 = vshrl.u32 %v220_v28, %v38_v12  ;;  %vm56_vm3 = vcmp.lt.s32.totalorder %v36_v11, 2  ;;  %vm57_vm4 = vcmp.lt.s32.totalorder %v36_v11, 3 }
  0x26   :  { %v42_v31 = vor.u32 %v41_v24, %v40_v14  ;;  %v45_v32 = vor.u32 %v44_v25, %v43_v16  ;;  %v48_v33 = vor.u32 %v47_v26, %v46_v18 }
  0x27   :  { %v51_v34 = vor.u32 %v50_v27, %v49_v20  ;;  %v54_v35 = vor.u32 %v53_v29, %v52_v22 }
  0x28   :  { %v59_v36 = vsel %vm55_vm1, %v39_v23, %v42_v31  ;;  %v60_v37 = vsel %vm58_vm2, %v48_v33, 2102212464  ;;  %v63_v38 = vsel %vm55_vm1, %v42_v31, %v45_v32  ;;  %v67_v39 = vsel %vm55_vm1, %v45_v32, %v48_v33 }
  0x29   :  { %v61_v40 = vsel %vm57_vm4, %v45_v32, %v60_v37  ;;  %v64_v41 = vsel %vm58_vm2, %v51_v34, 920167782  ;;  %v68_v42 = vsel %vm58_vm2, %v54_v35, 1326507024 }
  0x2a   :  { %v65_v43 = vsel %vm57_vm4, %v48_v33, %v64_v41  ;;  %v69_v44 = vsel %vm57_vm4, %v51_v34, %v68_v42  ;;  %v62_v45 = vsel %vm56_vm3, %v59_v36, %v61_v40 }
  0x2b   :  { %v66_v46 = vsel %vm56_vm3, %v63_v38, %v65_v43  ;;  %v70_v47 = vsel %vm56_vm3, %v67_v39, %v69_v44  ;;  %v78_v52 = vmul.u32 %v71_v30, %v62_v45 }
  0x2c   :  { %v253_v48 = vmul.u32.u64.low %v71_v30, %v70_v47  ;;  %v254_v49 = vmul.u32.u64.high %v71_v30, %v70_v47, %v253_v48  ;;  %v256_v50 = vmul.u32.u64.low %v71_v30, %v66_v46  ;;  %v257_v51 = vmul.u32.u64.high %v71_v30, %v66_v46, %v256_v50 }
  0x2e   :  { %vm80_vm5 = vc.u32 %v254_v49, %v256_v50  ;;  %v81_v53 = vadd.s32 1, %v257_v51  ;;  %v79_v2 = vadd.s32 %v256_v50, %v254_v49 }
  0x30   :  { %v82_v54 = vsel %vm80_vm5, %v81_v53, %v257_v51 }
  0x31   :  { %v83_v55 = vadd.s32 %v82_v54, %v78_v52 }
  0x33   :  { %v84_v56 = vadd.s32 536870912, %v83_v55 }
  0x35   :  { %v85_v57 = vshrl.u32 %v84_v56, 30 }
  0x37   :  { %v86_v58 = vshll.u32 %v85_v57, 30  ;;  %v109_v17 = vsub.s32 4, %v85_v57 }
  0x39   :  { %v87_v59 = vsub.s32 %v83_v55, %v86_v58  ;;  %v110_v20 = vsel %vm25_vm7, %v109_v17, %v85_v57 }
  0x3a   :  { %v112_v21 = vsel %vm24_vm8, 0, %v110_v20 }
  0x3b   :  { %v89_v60 = vsub.s32 0, %v87_v59  ;;  %v116_v22 = vand.u32 3, %v112_v21 }
  0x3d   :  { %v147_v61 = vmin.u32 %v89_v60, %v87_v59  ;;  %vm121_vm9 = vcmp.eq.s32.totalorder %v116_v22, 2  ;;  %vm118_vm10 = vcmp.eq.s32.totalorder %v116_v22, 0  ;;  %vm117_vm11 = vcmp.lt.s32.totalorder %v116_v22, 2 }
  0x3f   :  { %v91_v62 = vclz %v147_v61 }
  0x41   :  { %v148_v63 = vadd.s32 4294967294, %v91_v62 }
  0x43   :  { %vm149_vm6 = vcmp.lt.s32.totalorder %v148_v63, 0 }
  0x44   :  { %v94_v3 = vsel %vm149_vm6, 0, %v148_v63 }
  0x45   :  { %v95_v5 = vsub.s32 32, %v94_v3  ;;  %v96_v6 = vshll.u32 %v87_v59, %v94_v3  ;;  %v99_v7 = vsub.s32 4294967266, %v94_v3 }
  0x47   :  { %v97_v8 = vshrl.u32 %v79_v2, %v95_v5  ;;  %v100_v9 = vadd.s32 127, %v99_v7 }
  0x49   :  { %v98_v10 = vor.u32 %v97_v8, %v96_v6  ;;  %v101_v11 = vshll.u32 %v100_v9, 23 }
  0x4b   :  { %v102_v12 = vor.u32 4788187, %v101_v11  ;;  %v105_v13 = vcvt.s32.f32 %v98_v10 }
  0x4d   :  { %v103_v14 = vand.u32 2147483647, %v102_v12 }
  0x4f   :  { %v106_v15 = vmul.f32 %v105_v13, %v103_v14 }
  0x51   :  { %v107_v16 = vxor.u32 2147483648, %v106_v15 }
  0x53   :  { %v108_v18 = vsel %vm25_vm7, %v107_v16, %v106_v15 }
  0x54   :  { %v111_v19 = vsel %vm24_vm8, %v247_v1, %v108_v18 }
  0x55   :  { %162 = vcosq.f32 %v111_v19 }
  0x56   :  { %164 = vsinq.f32 %v111_v19 }
  0x5f   :  { %v163_v23 = vpop.eup %162 }
  0x60   :  { %v165_v24 = vpop.eup %164  ;;  %v122_v25 = vxor.u32 2147483648, %v163_v23 }
  0x61   :  { %v119_v26 = vxor.u32 2147483648, %v165_v24 }
  0x62   :  { %v123_v4 = vsel %vm121_vm9, %v122_v25, %v165_v24 }
  0x63   :  { %v120_v27 = vsel %vm118_vm10, %v163_v23, %v119_v26 }
  0x64   :  { %v124_v28 = vsel %vm117_vm11, %v120_v27, %v123_v4 }
  0x65   :  { %v125_v29 = vsel %vm115_vm12, nan, %v124_v28 }
  0x66   :  { %v126_v30 = vadd.f32 1.0, %v125_v29 }
  0x68   :  { %v127_v31 = vmul.f32 0.5, %v126_v30 }
  0x6a   :  { %v129_v32 = vsel %vm128_vm13, %v127_v31, 0.0 }
  0x6b   :  { %130 = vst [vmem:[#allocation5] sm:$0x1] %v129_v32 }
  0x6c   :  { %199 = shalt.err (!%p196_p12)
}
  0x6d   :  { %s200_s24 = scalar_lea.hbm %s282_s1, 16 }
  0x6e   :  { %p201_p13 = scmp.ne.s32.totalorder %s282_s1, %s200_s24  ;;  %p204_p0 = scmp.lt.u32.totalorder %s200_s24, %s282_s1 }
  0x70   :  { %p206_p1 = pnand %p204_p0, %p201_p13 }
  0x72   :  { %209 = shalt.err (!%p206_p1)
}
  0x73   :  { %140 = dma.vmem_to_hbm [thread:$0]  %s138_s19, 16, %s282_s1, [#allocation4]  }
  0x74   :  { %212 = dma.done.wait [#allocation4], 16  }
  0x75   :  { %213 = vsyncadd [#allocation4], 4294967280 }
  0x76   :  { %144 = vsyncpa [#allocation3], 1 }
  0x77   :  { %145 = vsyncpa [#allocation4], 1 }

</bundles_post_ra>
